<compile_context>
chip_gen: v7x
topology: tpu7x:2x2x1
jax: 0.10.0
libtpu: 0.0.40
codegen_flags: <defaults>
</compile_context>

<pallas_src>
import functools

import jax
import jax.numpy as jnp
from jax import lax
from jax.experimental import pallas as pl
from jax.experimental.pallas import tpu as pltpu


_LANE = 128
_SUBLANE = 8


def _round_up(x, m):
    return ((x + m - 1) // m) * m


def _vmem_capacity_bytes():
    try:
        return int(pltpu.get_tpu_info().vmem_capacity_bytes)
    except Exception:
        return 64 * 1024 * 1024          # conservative (v7x-sized) fallback


def _vmem_limit_bytes(est_input_bytes, cap):
    # double-buffered inputs + scratch + headroom, capped per-chip (v7x: <= 48 MB)
    limit = max(32 * 1024 * 1024, int(est_input_bytes) + 8 * 1024 * 1024)
    return int(min(limit, (cap * 3) // 4, 100 * 1024 * 1024))


# ---------------------------------------------------------------------------
# classes == 2: dense (2, R, 128) layout; x0/x1/targets are full (tile_r, 128)
# ---------------------------------------------------------------------------
def _ls_binary_kernel(pred_ref, tgt_ref, out_ref, acc_ref, *, fill, conf, n_rows, tile_r):
    i = pl.program_id(0)

    @pl.when(i == 0)
    def _init():
        acc_ref[...] = jnp.zeros_like(acc_ref)

    x0 = pred_ref[0].astype(jnp.float32)          # (tile_r, 128) class-0 logits
    x1 = pred_ref[1].astype(jnp.float32)          # (tile_r, 128) class-1 logits
    t = tgt_ref[...]                              # (tile_r, 128) int32

    # pairwise logsumexp: max(x0, x1) + log(1 + exp(-|x0 - x1|))
    m = jnp.maximum(x0, x1)
    lse = jnp.log(1.0 + jnp.exp(-jnp.abs(x0 - x1)))
    x_t = jnp.where(t == 0, x0, x1)               # x[target] for C == 2
    per = (m + lse) - fill * (x0 + x1) - (conf - fill) * x_t     # (tile_r, 128)

    # mask samples past the real batch size (zero padding / partial last tile);
    # masking must happen before accumulation (OOB block rows read garbage).
    row = lax.broadcasted_iota(jnp.int32, per.shape, 0)
    lane = lax.broadcasted_iota(jnp.int32, per.shape, 1)
    sample = (i * tile_r + row) * _LANE + lane
    per = jnp.where(sample < n_rows, per, 0.0)

    # one cross-sublane reduce per step into a lane-dense (1, 128) accumulator
    acc_ref[...] += jnp.sum(per, axis=0, keepdims=True)

    @pl.when(i == pl.num_programs(0) - 1)
    def _fini():
        total = jnp.sum(acc_ref[...], axis=1, keepdims=True)     # (1, 1)
        out_ref[...] = total * (1.0 / n_rows)


# ---------------------------------------------------------------------------
# general C: (tile, C) row tiles, per-step reduction into a (1, 1) accumulator
# ---------------------------------------------------------------------------
def _ls_general_kernel(pred_ref, tgt_ref, out_ref, acc_ref, *, fill, conf, n_rows, tile_n):
    i = pl.program_id(0)

    @pl.when(i == 0)
    def _init():
        acc_ref[...] = jnp.zeros_like(acc_ref)

    x = pred_ref[...].astype(jnp.float32)         # (tile, C)
    tgt = tgt_ref[...]                            # (tile, 1) int32

    m = jnp.max(x, axis=-1, keepdims=True)                                  # (tile, 1)
    lse = jnp.log(jnp.sum(jnp.exp(x - m), axis=-1, keepdims=True))          # (tile, 1)
    sum_x = jnp.sum(x, axis=-1, keepdims=True)                              # (tile, 1)
    col = lax.broadcasted_iota(jnp.int32, x.shape, 1)
    x_t = jnp.sum(jnp.where(col == tgt, x, 0.0), axis=-1, keepdims=True)    # (tile, 1)

    per = (m + lse) - fill * sum_x - (conf - fill) * x_t                    # (tile, 1)

    row = lax.broadcasted_iota(jnp.int32, per.shape, 0) + i * tile_n
    per = jnp.where(row < n_rows, per, 0.0)

    # single reduce + (1,1) accumulate per step (no (tile,1) read-modify-write)
    acc_ref[...] += jnp.sum(per, axis=0, keepdims=True)

    @pl.when(i == pl.num_programs(0) - 1)
    def _fini():
        out_ref[...] = acc_ref[...] * (1.0 / n_rows)


# ---------------------------------------------------------------------------
# wrapper
# ---------------------------------------------------------------------------
def label_smoothing_loss(pred, target, classes=2, smoothing=1e-05, dim=-1, tile_n=None):
    """pred: (N, C) float (any dtype); target: (N,) int class indices. Returns f32 scalar."""
    assert dim in (-1, 1), "kernel implements the (N, C) class-last layout"
    assert classes >= 2, "smoothing/(classes-1) requires classes >= 2"
    n, c = pred.shape
    assert c == classes, (c, classes)

    confidence = float(1.0 - smoothing)
    fill = float(smoothing / (classes - 1))
    target = target.astype(jnp.int32)
    itemsize = jnp.dtype(pred.dtype).itemsize

    vmem_cap = _vmem_capacity_bytes()
    input_budget = min(int(vmem_cap * 0.4), 48 * 1024 * 1024)   # double-buffered inputs

    if c == 2:
        # ---- binary path: sublane+lane dense (2, R, 128) layout ---------------
        n_pad = _round_up(n, _LANE)
        r_rows = n_pad // _LANE
        # TODO(synk): the class-major layout still costs one extra HBM pass for the
        # transpose; a transpose-free variant would keep pred row-major (lane-
        # interleaved classes) and de-interleave in-kernel on the idle XLU slot.
        pred_in = pred.T                                        # (2, N)
        if n_pad != n:
            pred_in = jnp.pad(pred_in, ((0, 0), (0, n_pad - n)))
            target = jnp.pad(target, (0, n_pad - n))
        pred_in = pred_in.reshape(2, r_rows, _LANE)             # free (contiguous)
        tgt_in = target.reshape(r_rows, _LANE)                  # free (contiguous)

        samples_per_step = tile_n if tile_n is not None else 131072
        samples_per_step = max(_LANE, min(int(samples_per_step), n_pad))
        tile_r = _round_up(pl.cdiv(samples_per_step, _LANE), _SUBLANE)
        per_row_vmem = _LANE * (2 * itemsize + 4)               # pred pair + i32 target
        vmem_rows = max(_SUBLANE, (input_budget // (2 * per_row_vmem)) // _SUBLANE * _SUBLANE)
        tile_r = min(tile_r, vmem_rows)
        grid_n = pl.cdiv(r_rows, tile_r)

        kernel = functools.partial(
            _ls_binary_kernel, fill=fill, conf=confidence, n_rows=n, tile_r=tile_r)
        in_specs = [
            pl.BlockSpec((2, tile_r, _LANE), lambda i: (0, i, 0)),
            pl.BlockSpec((tile_r, _LANE), lambda i: (i, 0)),
        ]
        scratch = [pltpu.VMEM((1, _LANE), jnp.float32)]
        est_in = 2 * tile_r * per_row_vmem
        transcendentals = 2 * n
        inputs = (pred_in, tgt_in)
    else:
        # ---- general path: VMEM-aware row tiles ------------------------------
        lane_c = _round_up(c, _LANE)
        # per-row VMEM footprint: lane-padded pred row + lane-padded (tile,1) i32 row
        per_row_vmem = lane_c * itemsize + _LANE * 4
        per_row_hbm = c * itemsize + 4
        if tile_n is not None:
            tile = int(tile_n)
        else:
            vmem_rows = max(_SUBLANE, input_budget // (2 * per_row_vmem))
            hbm_rows = max(_SUBLANE, (2 * 1024 * 1024) // per_row_hbm)   # ~2 MB / step
            tile = min(vmem_rows, hbm_rows, 32768)
        tile = _round_up(max(1, min(tile, n)), _SUBLANE)
        grid_n = pl.cdiv(n, tile)

        pred_in = pred
        # TODO(synk): (tile, 1) i32 targets are lane-padded in VMEM; a lane-major or
        # SMEM target layout plus a class-axis grid with online logsumexp would keep
        # row tiles large for vocab-scale C.
        tgt_in = target.reshape(n, 1)
        kernel = functools.partial(
            _ls_general_kernel, fill=fill, conf=confidence, n_rows=n, tile_n=tile)
        in_specs = [
            pl.BlockSpec((tile, c), lambda i: (i, 0)),
            pl.BlockSpec((tile, 1), lambda i: (i, 0)),
        ]
        scratch = [pltpu.VMEM((1, 1), jnp.float32)]
        est_in = 2 * tile * per_row_vmem
        transcendentals = n * c + n
        inputs = (pred_in, tgt_in)

    cost = pl.CostEstimate(
        flops=int(10 * n * c),
        transcendentals=int(transcendentals),
        bytes_accessed=int(n * c * itemsize + n * 4 + 4),
    )

    out = pl.pallas_call(
        kernel,
        out_shape=jax.ShapeDtypeStruct((1, 1), jnp.float32),
        grid_spec=pltpu.PrefetchScalarGridSpec(
            num_scalar_prefetch=0,
            grid=(grid_n,),
            in_specs=in_specs,
            out_specs=pl.BlockSpec((1, 1), lambda i: (0, 0)),
            scratch_shapes=scratch,
        ),
        compiler_params=pltpu.CompilerParams(
            # accumulator is carried across the (single) grid axis
            dimension_semantics=("arbitrary",),
            vmem_limit_bytes=_vmem_limit_bytes(est_in, vmem_cap),
        ),
        cost_estimate=cost,
    )(*inputs)
    return out[0, 0]


def _reference(pred, target, classes, smoothing):
    confidence = 1.0 - smoothing
    logp = jax.nn.log_softmax(pred.astype(jnp.float32), axis=-1)
    true_dist = jnp.full_like(logp, smoothing / (classes - 1))
    onehot = jax.nn.one_hot(target, classes, dtype=jnp.bool_)
    true_dist = jnp.where(onehot, confidence, true_dist)
    return jnp.mean(jnp.sum(-true_dist * logp, axis=-1))


if __name__ == "__main__":
    key = jax.random.PRNGKey(0)
    k1, k2, k3, k4, k5, k6 = jax.random.split(key, 6)

    # Case 1: module defaults (classes=2, smoothing=1e-5), small batch (padded to 128).
    N1, C1 = 8, 2
    pred1 = jax.random.normal(k1, (N1, C1), dtype=jnp.float32)
    tgt1 = jax.random.randint(k2, (N1,), 0, C1, dtype=jnp.int32)
    out1 = jax.block_until_ready(label_smoothing_loss(pred1, tgt1, classes=C1, smoothing=1e-05))
    ref1 = _reference(pred1, tgt1, C1, 1e-05)
    assert jnp.allclose(out1, ref1, rtol=1e-5, atol=1e-5), (out1, ref1)

    # Case 2: classes=2, non-multiple-of-128 batch + explicit small tile.
    N2 = 300
    pred2 = jax.random.normal(k3, (N2, 2), dtype=jnp.float32)
    tgt2 = jax.random.randint(k4, (N2,), 0, 2, dtype=jnp.int32)
    out2 = jax.block_until_ready(
        label_smoothing_loss(pred2, tgt2, classes=2, smoothing=1e-05, tile_n=128))
    ref2 = _reference(pred2, tgt2, 2, 1e-05)
    assert jnp.allclose(out2, ref2, rtol=1e-5, atol=1e-5), (out2, ref2)

    # Case 3: general class count, multi-tile + masked partial last tile.
    N3, C3 = 50, 10
    pred3 = jax.random.normal(k5, (N3, C3), dtype=jnp.float32)
    tgt3 = jax.random.randint(k6, (N3,), 0, C3, dtype=jnp.int32)
    out3 = jax.block_until_ready(
        label_smoothing_loss(pred3, tgt3, classes=C3, smoothing=0.1, tile_n=16))
    ref3 = _reference(pred3, tgt3, C3, 0.1)
    assert jnp.allclose(out3, ref3, rtol=1e-5, atol=1e-5), (out3, ref3)

    # Case 4: general path with default (VMEM-aware) tile selection.
    out4 = jax.block_until_ready(label_smoothing_loss(pred3, tgt3, classes=C3, smoothing=0.1))
    assert jnp.allclose(out4, ref3, rtol=1e-5, atol=1e-5), (out4, ref3)

    print("KERNEL_OK")
</pallas_src>

<mosaic_0001>
module attributes {stable_mosaic.version = 11 : i64} {
  func.func @_ls_binary_kernel(%arg0: i32, %arg1: memref<2x8x128xf32, #tpu.memory_space<vmem>>, %arg2: memref<8x128xi32, #tpu.memory_space<vmem>>, %arg3: memref<1x1xf32, #tpu.memory_space<vmem>>, %arg4: memref<1x128xf32, #tpu.memory_space<vmem>>) attributes {dimension_semantics = [#tpu.dimension_semantics<arbitrary>], iteration_bounds = array<i64: 1>, scalar_prefetch = 0 : i64, scratch_operands = 1 : i64, tpu.core_type = #tpu.core_type<tc>, window_params = [{transform_indices = @transform_0, window_bounds = array<i64: 2, 8, 128>}, {transform_indices = @transform_1, window_bounds = array<i64: 8, 128>}, {pipeline_mode = #tpu.pipeline_mode<synchronous>, transform_indices = @transform_2, window_bounds = array<i64: 1, 1>}]} {
    %c0_i32 = arith.constant 0 : i32
    %0 = arith.cmpi eq, %arg0, %c0_i32 : i32
    %1 = arith.extui %0 : i1 to i32
    %c0_i32_0 = arith.constant 0 : i32
    %2 = arith.cmpi ne, %1, %c0_i32_0 : i32
    scf.if %2 {
      %cst_20 = arith.constant 0.000000e+00 : f32
      %48 = vector.broadcast %cst_20 : f32 to vector<1x128xf32>
      %c0_21 = arith.constant 0 : index
      %c0_22 = arith.constant 0 : index
      %49 = vector.load %arg4[%c0_21, %c0_22] : memref<1x128xf32, #tpu.memory_space<vmem>>, vector<1x128xf32>
      tpu.vector_store %arg4[%c0_21, %c0_22], %48 {strides = array<i32>} : memref<1x128xf32, #tpu.memory_space<vmem>>, vector<1x128xf32>,
    } else {
    }
    %c0 = arith.constant 0 : index
    %c0_1 = arith.constant 0 : index
    %c0_2 = arith.constant 0 : index
    %3 = vector.load %arg1[%c0, %c0_1, %c0_2] : memref<2x8x128xf32, #tpu.memory_space<vmem>>, vector<1x8x128xf32>
    %4 = vector.shape_cast %3 : vector<1x8x128xf32> to vector<8x128xf32>
    %c1 = arith.constant 1 : index
    %c0_3 = arith.constant 0 : index
    %c0_4 = arith.constant 0 : index
    %5 = vector.load %arg1[%c1, %c0_3, %c0_4] : memref<2x8x128xf32, #tpu.memory_space<vmem>>, vector<1x8x128xf32>
    %6 = vector.shape_cast %5 : vector<1x8x128xf32> to vector<8x128xf32>
    %c0_5 = arith.constant 0 : index
    %c0_6 = arith.constant 0 : index
    %7 = vector.load %arg2[%c0_5, %c0_6] : memref<8x128xi32, #tpu.memory_space<vmem>>, vector<8x128xi32>
    %8 = arith.maximumf %4, %6 : vector<8x128xf32>
    %9 = arith.subf %4, %6 : vector<8x128xf32>
    %10 = math.absf %9 : vector<8x128xf32>
    %cst = arith.constant 0.000000e+00 : f32
    %11 = vector.broadcast %cst : f32 to vector<8x128xf32>
    %12 = arith.subf %11, %10 : vector<8x128xf32>
    %13 = math.exp %12 : vector<8x128xf32>
    %cst_7 = arith.constant 1.000000e+00 : f32
    %14 = vector.broadcast %cst_7 : f32 to vector<8x128xf32>
    %15 = arith.addf %14, %13 : vector<8x128xf32>
    %16 = math.log %15 : vector<8x128xf32>
    %c0_i32_8 = arith.constant 0 : i32
    %17 = vector.broadcast %c0_i32_8 : i32 to vector<8x128xi32>
    %18 = arith.cmpi eq, %7, %17 : vector<8x128xi32>
    %19 = arith.select %18, %4, %6 : vector<8x128xi1>, vector<8x128xf32>
    %20 = arith.addf %8, %16 : vector<8x128xf32>
    %21 = arith.addf %4, %6 : vector<8x128xf32>
    %cst_9 = arith.constant 9.99999974E-6 : f32
    %22 = vector.broadcast %cst_9 : f32 to vector<8x128xf32>
    %23 = arith.mulf %22, %21 : vector<8x128xf32>
    %24 = arith.subf %20, %23 : vector<8x128xf32>
    %cst_10 = arith.constant 0.999979972 : f32
    %25 = vector.broadcast %cst_10 : f32 to vector<8x128xf32>
    %26 = arith.mulf %25, %19 : vector<8x128xf32>
    %27 = arith.subf %24, %26 : vector<8x128xf32>
    %28 = tpu.iota {dimensions = array<i32: 0>} : vector<8x128xi32>
    %29 = tpu.iota {dimensions = array<i32: 1>} : vector<8x128xi32>
    %c8_i32 = arith.constant 8 : i32
    %30 = arith.muli %arg0, %c8_i32 : i32
    %31 = vector.broadcast %30 : i32 to vector<8x128xi32>
    %32 = arith.addi %31, %28 : vector<8x128xi32>
    %c128_i32 = arith.constant 128 : i32
    %33 = vector.broadcast %c128_i32 : i32 to vector<8x128xi32>
    %34 = arith.muli %32, %33 : vector<8x128xi32>
    %35 = arith.addi %34, %29 : vector<8x128xi32>
    %c8_i32_11 = arith.constant 8 : i32
    %36 = vector.broadcast %c8_i32_11 : i32 to vector<8x128xi32>
    %37 = arith.cmpi slt, %35, %36 : vector<8x128xi32>
    %cst_12 = arith.constant 0.000000e+00 : f32
    %38 = vector.broadcast %cst_12 : f32 to vector<8x128xf32>
    %39 = arith.select %37, %27, %38 : vector<8x128xi1>, vector<8x128xf32>
    %c0_13 = arith.constant 0 : index
    %c0_14 = arith.constant 0 : index
    %40 = vector.load %arg4[%c0_13, %c0_14] : memref<1x128xf32, #tpu.memory_space<vmem>>, vector<1x128xf32>
    %cst_15 = arith.constant dense<0.000000e+00> : vector<128xf32>
    %41 = vector.multi_reduction <add>, %39, %cst_15 [0] : vector<8x128xf32> to vector<128xf32>
    %42 = vector.shape_cast %41 : vector<128xf32> to vector<1x128xf32>
    %43 = arith.addf %40, %42 : vector<1x128xf32>
    %c0_16 = arith.constant 0 : index
    %c0_17 = arith.constant 0 : index
    %44 = vector.load %arg4[%c0_16, %c0_17] : memref<1x128xf32, #tpu.memory_space<vmem>>, vector<1x128xf32>
    tpu.vector_store %arg4[%c0_16, %c0_17], %43 {strides = array<i32>} : memref<1x128xf32, #tpu.memory_space<vmem>>, vector<1x128xf32>,
    %c0_i32_18 = arith.constant 0 : i32
    %45 = arith.cmpi eq, %arg0, %c0_i32_18 : i32
    %46 = arith.extui %45 : i1 to i32
    %c0_i32_19 = arith.constant 0 : i32
    %47 = arith.cmpi ne, %46, %c0_i32_19 : i32
    scf.if %47 {
      %c0_20 = arith.constant 0 : index
      %c0_21 = arith.constant 0 : index
      %48 = vector.load %arg4[%c0_20, %c0_21] : memref<1x128xf32, #tpu.memory_space<vmem>>, vector<1x128xf32>
      %cst_22 = arith.constant dense<0.000000e+00> : vector<1xf32>
      %49 = vector.multi_reduction <add>, %48, %cst_22 [1] : vector<1x128xf32> to vector<1xf32>
      %50 = vector.shape_cast %49 : vector<1xf32> to vector<1x1xf32>
      %cst_23 = arith.constant 1.250000e-01 : f32
      %51 = vector.broadcast %cst_23 : f32 to vector<1x1xf32>
      %52 = arith.mulf %50, %51 : vector<1x1xf32>
      %c0_24 = arith.constant 0 : index
      %c0_25 = arith.constant 0 : index
      %53 = vector.load %arg3[%c0_24, %c0_25] : memref<1x1xf32, #tpu.memory_space<vmem>>, vector<1x1xf32>
      tpu.vector_store %arg3[%c0_24, %c0_25], %52 {strides = array<i32>} : memref<1x1xf32, #tpu.memory_space<vmem>>, vector<1x1xf32>,
    } else {
    }
    return
  }
  func.func @transform_0(%arg0: i32) -> (i32, i32, i32) {
    %c0_i32 = arith.constant 0 : i32
    %c0_i32_0 = arith.constant 0 : i32
    %c0_i32_1 = arith.constant 0 : i32
    return %c0_i32, %arg0, %c0_i32_0 : i32, i32, i32
  }
  func.func @transform_1(%arg0: i32) -> (i32, i32) {
    %c0_i32 = arith.constant 0 : i32
    %c0_i32_0 = arith.constant 0 : i32
    return %arg0, %c0_i32 : i32, i32
  }
  func.func @transform_2(%arg0: i32) -> (i32, i32) {
    %c0_i32 = arith.constant 0 : i32
    %c0_i32_0 = arith.constant 0 : i32
    %c0_i32_1 = arith.constant 0 : i32
    return %c0_i32, %c0_i32_0 : i32, i32
  }
}

</mosaic_0001>

<bundles_post_ra>
// kernel: tpu_custom_call.1
= control target key start
LH: loop header
LB: loop body
LE: loop exit
PB: predicated region body
PF: predicated region fallthrough
CT: control target
= control target key end

     0   :  { %7 = vsyncpa [#allocation4], 0  ;;  %s204_s0 = inlined_call_operand.hbm [shape: f32[2,1,128], index: 0, kind: input, shape index: {}]   ;;  %s205_s1 = inlined_call_operand.vmem [shape: s32[1,128], index: 1, kind: input, shape index: {}]   ;;  %s206_s2 = inlined_call_operand.hbm [shape: f32[1,1], index: 2, kind: output, shape index: {}]  }
   0x1   :  { %8 = vsyncpa [#allocation5], 0 }
   0x2   :  { %13 = vsyncadd [#allocation4], 224  ;;  %s18_s9 = sld [smem:[#allocation0]]   ;;  %s163_s10 = smov [#allocation3]  }
   0x3   :  { %s26_s11 = sshll.u32 %s163_s10, 4  ;;  %s164_s12 = smov 16   ;;  %s27_s11 = int_to_ptr.vmem [resolvable:$true] %s26_s11 }
   0x4   :  { %33 = sst [smem:[#allocation8]] %s164_s12  ;;  %s165_s13 = smov 128  }
   0x5   :  { %35 = sst [smem:[#allocation8 + $0x1]] %s165_s13  ;;  %s166_s14 = smov 1  }
   0x6   :  { %37 = sst [smem:[#allocation8 + $0x2]] %s166_s14  ;;  %s167_s17 = smov [#allocation4]  }
   0x7   :  { %39 = sst [smem:[#allocation8 + $0x3]] %s164_s12  ;;  %s168_s18 = smov [#allocation7]  }
   0x8   :  { %s123_s15 = sshll.u32 %s18_s9, 26  ;;  %41 = sst [smem:[#allocation8 + $0x4]] %s164_s12 }
   0x9   :  { %s124_s16 = sadd.s32 134217728, %s123_s15  ;;  %43 = sst [smem:[#allocation8 + $0x5]] %s166_s14 }
   0xa   :  { %45 = dma.general %s204_s0, 32, %s27_s11, %s167_s17, %s168_s18, [#allocation8], %s124_s16, 0  }
   0xb   :  { %159 = dma.done.wait [#allocation4], 256  }
   0xc   :  { %160 = vsyncadd [#allocation4], 4294967040  ;;  %v169_v0 = vmov 0.0   ;;  %v56_v1 = vld [vmem:[#allocation3] sm:$0xff]  ;;  %v58_v2 = vld [vmem:[#allocation3 + $0x8] sm:$0xff]  ;;  %v77_v9 = vlaneseq  ;;  %vm101_vm2 = vcmask 1040384  }
   0xd   :  { %55 = vst [vmem:[#allocation2] sm:$0x1] %v169_v0  ;;  %v61_v3 = vsub.f32 %v56_v1, %v58_v2  ;;  %v59_v10 = vld [vmem:[%s205_s1] sm:$0xff]  ;;  %v72_v12 = vadd.f32 %v58_v2, %v56_v1  ;;  %v60_v15 = vmax.f32 %v56_v1, %v58_v2  ;;  %s170_s0 = smov [#allocation6]   ;;  %vm106_vm3 = vcmask 0  }
   0xe   :  { %v78_v11 = vshrl.u32 %v77_v9, 7  ;;  %vm69_vm0 = vcmp.eq.s32.totalorder %v59_v10, 0  ;;  %v80_v13 = vand.u32 127, %v77_v9  ;;  %s114_s1 = sshll.u32 %s170_s0, 4  ;;  %s115_s1 = int_to_ptr.vmem [resolvable:$true] %s114_s1 }
   0xf   :  { %v62_v4 = vand.u32 2147483647, %v61_v3  ;;  %v70_v17 = vsel %vm69_vm0, %v56_v1, %v58_v2  ;;  %v73_v19 = vmul.f32 1e-05, %v72_v12  ;;  %s137_s23 = scalar_lea.vmem %s115_s1, 16  ;;  %s141_s24 = scalar_lea.vmem %s115_s1, 32 }
  0x10   :  { %v84_v14 = vmul.u32 128, %v78_v11  ;;  %v75_v22 = vmul.f32 0.99998, %v70_v17  ;;  %p138_p0 = scmp.ne.s32.totalorder %s115_s1, %s137_s23  ;;  %p142_p1 = scmp.lt.s32.totalorder %s115_s1, %s115_s1 }
  0x11   :  { %v63_v5 = vsub.f32 0.0, %v62_v4  ;;  %p143_p2 = scmp.lt.s32.totalorder %s141_s24, %s137_s23 }
  0x12   :  { %v85_v20 = vadd.s32 %v84_v14, %v80_v13 }
  0x13   :  { %v64_v6 = vmul.f32 1.442695, %v63_v5  ;;  %p144_p3 = por %p143_p2, %p142_p1 }
  0x14   :  { %vm86_vm1 = vcmp.lt.s32.totalorder %v85_v20, 8  ;;  %v88_v31 = vld [vmem:[#allocation2] sm:$0x1] }
  0x15   :  { %133 = vpow2.f32 %v64_v6  ;;  %p145_p4 = pnand %p144_p3, %p138_p0 }
  0x1f   :  { %v134_v7 = vpop.eup %133 }
  0x20   :  { %v66_v8 = vadd.f32 1.0, %v134_v7 }
  0x22   :  { %135 = vlog2.f32 %v66_v8 }
  0x2c   :  { %v136_v16 = vpop.eup %135 }
  0x2d   :  { %v68_v18 = vmul.f32 0.6931472, %v136_v16 }
  0x2f   :  { %v71_v21 = vadd.f32 %v68_v18, %v60_v15 }
  0x31   :  { %v74_v23 = vsub.f32 %v71_v21, %v73_v19 }
  0x33   :  { %v76_v24 = vsub.f32 %v74_v23, %v75_v22 }
  0x35   :  { %v87_v25 = vsel %vm86_vm1, %v76_v24, 0.0 }
  0x36   :  { %v89_v26 = vrot.slane %v87_v25, 4 }
  0x38   :  { %v90_v27 = vadd.f32 %v89_v26, %v87_v25 }
  0x3a   :  { %v91_v28 = vrot.slane %v90_v27, 2 }
  0x3c   :  { %v92_v29 = vadd.f32 %v91_v28, %v90_v27 }
  0x3e   :  { %v93_v30 = vrot.slane %v92_v29, 1 }
  0x40   :  { %v94_v32 = vadd.f32 %v93_v30, %v92_v29 }
  0x42   :  { %v95_v33 = vadd.f32 %v94_v32, %v88_v31 }
  0x44   :  { %96 = vst [vmem:[#allocation2] sm:$0x1] %v95_v33 }
  0x4b   :  { %v100_v34 = vld [vmem:[#allocation2] sm:$0x1] }
  0x4c   :  { %v102_v35 = vsel %vm101_vm2, %v100_v34, 0.0 }
  0x4d   :  { %103 = vadd.xlane.f32.xlu0 %v102_v35 }
  0xda   :  { %v104_v36 = vpop.xlane.xlu0 %103 }
  0xdb   :  { %v105_v37 = vmul.f32 0.125, %v104_v36 }
  0xdd   :  { %107 = vst.msk [vmem:[#allocation6] sm:$0x1] %vm106_vm3, %v105_v37 }
  0xde   :  { %148 = shalt.err (!%p145_p4)
}
  0xdf   :  { %s149_s27 = scalar_lea.hbm %s206_s2, 16 }
  0xe0   :  { %p150_p5 = scmp.ne.s32.totalorder %s206_s2, %s149_s27  ;;  %p153_p6 = scmp.lt.u32.totalorder %s149_s27, %s206_s2 }
  0xe2   :  { %p155_p7 = pnand %p153_p6, %p150_p5 }
  0xe4   :  { %158 = shalt.err (!%p155_p7)
}
  0xe5   :  { %117 = dma.vmem_to_hbm [thread:$0]  %s115_s1, 16, %s206_s2, [#allocation5]  }
  0xe6   :  { %161 = dma.done.wait [#allocation5], 16  }
  0xe7   :  { %162 = vsyncadd [#allocation5], 4294967280 }
  0xe8   :  { %121 = vsyncpa [#allocation4], 1 }
  0xe9   :  { %122 = vsyncpa [#allocation5], 1 }

</bundles_post_ra>
